<compile_context>
chip_gen: v7x
topology: tpu7x:2x2x1
jax: 0.10.0
libtpu: 0.0.40
codegen_flags: <defaults>
</compile_context>

<pallas_src>
import functools

import jax
import jax.numpy as jnp
from jax.experimental import pallas as pl
from jax.experimental.pallas import tpu as pltpu

HP = 128   # hidden dim padded to a full 128-lane vreg width
CP = 128   # class dim padded to a full 128-lane vreg width


def _full_spec(shape):
    """BlockSpec covering the whole array as a single block (grid=(1,))."""
    nd = len(shape)
    return pl.BlockSpec(shape, lambda i, _nd=nd: (0,) * _nd)


# --------------------------------------------------------------------------
# Fused forward kernel
# --------------------------------------------------------------------------
def _fused_kernel(adj_ref, x_ref, wg_ref, bg_ref, ids_ref,
                  tokf_ref, maskf_ref, emb_ref, wp_ref, bp_ref,
                  wf_ref, bf_ref, label_ref,
                  logits_ref, loss_ref, *, inv_batch):
    f32, bf16 = jnp.float32, jnp.bfloat16

    # ---- GCNConv hot path: Z = X @ Wg^T + b ; out = A_norm @ Z (bf16 MXU) ----
    z = jnp.dot(x_ref[...], wg_ref[...], preferred_element_type=f32) + bg_ref[...]
    out_gcn = jnp.dot(adj_ref[...], z.astype(bf16), preferred_element_type=f32)
    out_gcn = out_gcn.astype(bf16)                                     # [N, HP]

    # ---- take_logtis: ONE fused [2E, N] one-hot selector matmul for e1 & e2 ----
    e = label_ref.shape[0]
    n = adj_ref.shape[0]
    node_ids = jax.lax.broadcasted_iota(jnp.int32, (2 * e, n), 1)
    sel = jnp.where(node_ids == ids_ref[...], 1.0, 0.0).astype(bf16)   # [2E, N]
    gathered = jnp.dot(sel, out_gcn, preferred_element_type=f32)       # [2E, HP]
    e1 = gathered[:e]                                                  # [E, HP]
    e2 = gathered[e:]                                                  # [E, HP]

    # ---- synthetic sentence encoder: masked mean pool, V never in an output ----
    el = tokf_ref.shape[0]            # E * L (tokens flattened in glue)
    l = el // e
    v = emb_ref.shape[0]
    vocab_ids = jax.lax.broadcasted_iota(jnp.int32, (el, v), 1)
    # mask folded into the one-hot; single narrow temp, cast to bf16 for the MXU
    weighted = jnp.where(vocab_ids == tokf_ref[...],
                         maskf_ref[...], 0.0).astype(bf16)             # [E*L, V]
    tok_emb = jnp.dot(weighted, emb_ref[...],
                      preferred_element_type=f32)                      # [E*L, HP]
    seg_row = jax.lax.broadcasted_iota(jnp.int32, (e, el), 0) * l
    seg_col = jax.lax.broadcasted_iota(jnp.int32, (e, el), 1)
    p_seg = jnp.where((seg_col >= seg_row) & (seg_col < seg_row + l),
                      1.0, 0.0).astype(bf16)                           # [E, E*L]
    pooled_sum = jnp.dot(p_seg, tok_emb.astype(bf16),
                         preferred_element_type=f32)                   # [E, HP]
    denom = jnp.dot(p_seg, maskf_ref[...].astype(bf16),
                    preferred_element_type=f32)                        # [E, 1] = sum(mask)
    inv = pl.reciprocal(jnp.maximum(denom, 1.0), approx=False)         # exact, guarded
    pooled = pooled_sum * inv                                          # [E, HP]
    sent = jnp.tanh(jnp.dot(pooled.astype(bf16), wp_ref[...],
                            preferred_element_type=f32) + bp_ref[...]) # [E, HP]

    # ---- class_fc: single K = 3*HP matmul on concat([e1, e2, sent]) ----
    feat = jnp.concatenate([e1, e2, sent], axis=-1).astype(bf16)       # [E, 3*HP]
    logits = jnp.dot(feat, wf_ref[...], preferred_element_type=f32) + bf_ref[...]
    logits_ref[...] = logits                                           # [E, CP] lane-dense

    # ---- CrossEntropyLoss(mean); padded classes carry bias -1e9 -> exp == 0 ----
    m = jnp.max(logits, axis=-1, keepdims=True)
    lse = m + jnp.log(jnp.sum(jnp.exp(logits - m), axis=-1, keepdims=True))
    cls_ids = jax.lax.broadcasted_iota(jnp.int32, logits.shape, 1)
    lab_oh = jnp.where(cls_ids == label_ref[...], 1.0, 0.0)
    tgt = jnp.sum(lab_oh * logits, axis=-1, keepdims=True)
    loss_ref[...] = jnp.sum(lse - tgt, axis=0, keepdims=True) * inv_batch


def _sengraph_pallas(adj, x, wg, bg, ids, tokf, maskf,
                     emb, wp, bp, wf, bf, label):
    e = label.shape[0]
    args = (adj, x, wg, bg, ids, tokf, maskf, emb, wp, bp, wf, bf, label)
    kern = functools.partial(_fused_kernel, inv_batch=1.0 / e)
    return pl.pallas_call(
        kern,
        grid=(1,),
        in_specs=[_full_spec(a.shape) for a in args],
        out_specs=(_full_spec((e, CP)), _full_spec((1, 1))),
        out_shape=(jax.ShapeDtypeStruct((e, CP), jnp.float32),
                   jax.ShapeDtypeStruct((1, 1), jnp.float32)),
        compiler_params=pltpu.CompilerParams(
            dimension_semantics=("arbitrary",),
            vmem_limit_bytes=32 * 1024 * 1024),
    )(*args)


# --------------------------------------------------------------------------
# Parameters (deterministic synthetic init; shapes follow SenGraph.__init__).
# Weights are transposed / lane-padded / cast to bf16 ONCE here, not per step.
# --------------------------------------------------------------------------
def init_params(key, nfeature, nhidden, num_class, vocab, seq_len):
    del seq_len
    ks = jax.random.split(key, 7)
    s = 0.05
    h, f, c = nhidden, nfeature, num_class
    gcn_w = jax.random.normal(ks[0], (h, f), jnp.float32) * s     # Linear(F, H) weight
    gcn_b = jax.random.normal(ks[1], (h,), jnp.float32) * s
    emb = jax.random.normal(ks[2], (vocab, h), jnp.float32) * s   # synthetic BERT emb
    pool_w = jax.random.normal(ks[3], (h, h), jnp.float32) * s    # synthetic pooler
    pool_b = jax.random.normal(ks[4], (h,), jnp.float32) * s
    fc_w = jax.random.normal(ks[5], (c, 3 * h), jnp.float32) * s  # Linear(3H, C) weight
    fc_b = jax.random.normal(ks[6], (c,), jnp.float32) * s

    gcn_wT = jnp.zeros((f, HP), jnp.float32).at[:, :h].set(gcn_w.T)
    gcn_b_p = jnp.zeros((1, HP), jnp.float32).at[0, :h].set(gcn_b)
    emb_p = jnp.zeros((vocab, HP), jnp.float32).at[:, :h].set(emb)
    pool_w_p = jnp.zeros((HP, HP), jnp.float32).at[:h, :h].set(pool_w)
    pool_b_p = jnp.zeros((1, HP), jnp.float32).at[0, :h].set(pool_b)
    fc_wT = jnp.zeros((3 * HP, CP), jnp.float32)
    for blk in range(3):
        fc_wT = fc_wT.at[blk * HP:blk * HP + h, :c].set(
            fc_w[:, blk * h:(blk + 1) * h].T)
    # padded classes get a -1e9 bias so they vanish from softmax/CE
    fc_b_p = jnp.full((1, CP), -1e9, jnp.float32).at[0, :c].set(fc_b)

    return dict(
        gcn_wT=gcn_wT.astype(jnp.bfloat16), gcn_b=gcn_b_p,
        emb=emb_p.astype(jnp.bfloat16),
        pool_w=pool_w_p.astype(jnp.bfloat16), pool_b=pool_b_p,
        fc_wT=fc_wT.astype(jnp.bfloat16), fc_b=fc_b_p,
    )


# --------------------------------------------------------------------------
# SenGraph.forward(index, label, sentence_mask, features)
# --------------------------------------------------------------------------
def sengraph_forward(params, index, label, sentence_mask, features, *, num_class):
    idx_head, idx_tail = index
    n = features.shape[0]
    e = idx_head.shape[0]
    seq = sentence_mask.shape[-1]

    # ---- GCNConv glue: add self loops + normalization, as in message():
    #      deg computed over source endpoints (row) incl. self loops,
    #      norm = deg^-0.5[row] * deg^-0.5[col], aggregation at target (col)
    #      (MessagePassing flow='source_to_target', aggr='add').
    # TODO(synk): at realistic N replace this dense N^2 scatter-add with the
    # sparse edge-list path (per-edge norm + scalar-prefetched aggregation).
    loop = jnp.arange(n, dtype=idx_head.dtype)
    row = jnp.concatenate([idx_head, loop])
    col = jnp.concatenate([idx_tail, loop])
    deg = jnp.zeros((n,), jnp.float32).at[row].add(1.0)
    dis = deg ** -0.5
    norm = dis[row] * dis[col]
    adj = jnp.zeros((n, n), jnp.float32).at[col, row].add(norm)  # out[i]=sum_j A[i,j]x[j]

    ids = jnp.concatenate([idx_head, idx_tail]).astype(jnp.int32).reshape(2 * e, 1)
    tok_flat = sentence_mask[:, 0, :].astype(jnp.int32).reshape(e * seq, 1)
    mask_flat = sentence_mask[:, 1, :].astype(jnp.float32).reshape(e * seq, 1)

    logits_pad, loss = _sengraph_pallas(
        adj.astype(jnp.bfloat16), features.astype(jnp.bfloat16),
        params["gcn_wT"], params["gcn_b"],
        ids,
        tok_flat, mask_flat,
        params["emb"], params["pool_w"], params["pool_b"],
        params["fc_wT"], params["fc_b"],
        label.astype(jnp.int32).reshape(e, 1))
    return loss[0, 0], logits_pad[:, :num_class]


if __name__ == "__main__":
    # Small shapes consistent with the module: nhidden equals the sentence
    # encoder hidden size (class_fc = Linear(3 * nhidden, C)).
    N, F, H, C = 16, 32, 32, 4        # nodes, nfeature, nhidden, num_class
    E, L, V = 8, 8, 64                # batch (edges), seq len, vocab

    key = jax.random.PRNGKey(0)
    kp, k1, k2, k3, k4, k5, k6 = jax.random.split(key, 7)

    params = init_params(kp, F, H, C, V, L)

    idx_head = jax.random.randint(k1, (E,), 0, N, dtype=jnp.int32)
    idx_tail = jax.random.randint(k2, (E,), 0, N, dtype=jnp.int32)
    label = jax.random.randint(k3, (E,), 0, C, dtype=jnp.int32)
    tok_ids = jax.random.randint(k4, (E, L), 0, V, dtype=jnp.int32)
    lens = jax.random.randint(k5, (E, 1), 1, L + 1, dtype=jnp.int32)
    attn = (jnp.arange(L, dtype=jnp.int32)[None, :] < lens).astype(jnp.int32)
    sentence_mask = jnp.stack([tok_ids, attn], axis=1)               # [E, 2, L]
    features = jax.random.normal(k6, (N, F), jnp.float32)

    fwd = jax.jit(functools.partial(sengraph_forward, num_class=C))
    loss, logits = fwd(params, (idx_head, idx_tail), label, sentence_mask, features)
    jax.block_until_ready((loss, logits))
    assert logits.shape == (E, C) and loss.shape == ()
    assert bool(jnp.isfinite(loss))
    print("KERNEL_OK")
</pallas_src>

<mosaic_0001>
module attributes {stable_mosaic.version = 11 : i64} {
  func.func @_fused_kernel(%arg0: i32, %arg1: memref<16x16xbf16, #tpu.memory_space<vmem>>, %arg2: memref<16x32xbf16, #tpu.memory_space<vmem>>, %arg3: memref<32x128xbf16, #tpu.memory_space<vmem>>, %arg4: memref<1x128xf32, #tpu.memory_space<vmem>>, %arg5: memref<16x1xi32, #tpu.memory_space<vmem>>, %arg6: memref<64x1xi32, #tpu.memory_space<vmem>>, %arg7: memref<64x1xf32, #tpu.memory_space<vmem>>, %arg8: memref<64x128xbf16, #tpu.memory_space<vmem>>, %arg9: memref<128x128xbf16, #tpu.memory_space<vmem>>, %arg10: memref<1x128xf32, #tpu.memory_space<vmem>>, %arg11: memref<384x128xbf16, #tpu.memory_space<vmem>>, %arg12: memref<1x128xf32, #tpu.memory_space<vmem>>, %arg13: memref<8x1xi32, #tpu.memory_space<vmem>>, %arg14: memref<8x128xf32, #tpu.memory_space<vmem>>, %arg15: memref<1x1xf32, #tpu.memory_space<vmem>>) attributes {dimension_semantics = [#tpu.dimension_semantics<arbitrary>], iteration_bounds = array<i64: 1>, scalar_prefetch = 0 : i64, scratch_operands = 0 : i64, tpu.core_type = #tpu.core_type<tc>, window_params = [{pipeline_mode = #tpu.pipeline_mode<synchronous>, transform_indices = @transform_0, window_bounds = array<i64: 16, 16>}, {pipeline_mode = #tpu.pipeline_mode<synchronous>, transform_indices = @transform_1, window_bounds = array<i64: 16, 32>}, {pipeline_mode = #tpu.pipeline_mode<synchronous>, transform_indices = @transform_2, window_bounds = array<i64: 32, 128>}, {pipeline_mode = #tpu.pipeline_mode<synchronous>, transform_indices = @transform_3, window_bounds = array<i64: 1, 128>}, {pipeline_mode = #tpu.pipeline_mode<synchronous>, transform_indices = @transform_4, window_bounds = array<i64: 16, 1>}, {pipeline_mode = #tpu.pipeline_mode<synchronous>, transform_indices = @transform_5, window_bounds = array<i64: 64, 1>}, {pipeline_mode = #tpu.pipeline_mode<synchronous>, transform_indices = @transform_6, window_bounds = array<i64: 64, 1>}, {pipeline_mode = #tpu.pipeline_mode<synchronous>, transform_indices = @transform_7, window_bounds = array<i64: 64, 128>}, {pipeline_mode = #tpu.pipeline_mode<synchronous>, transform_indices = @transform_8, window_bounds = array<i64: 128, 128>}, {pipeline_mode = #tpu.pipeline_mode<synchronous>, transform_indices = @transform_9, window_bounds = array<i64: 1, 128>}, {pipeline_mode = #tpu.pipeline_mode<synchronous>, transform_indices = @transform_10, window_bounds = array<i64: 384, 128>}, {pipeline_mode = #tpu.pipeline_mode<synchronous>, transform_indices = @transform_11, window_bounds = array<i64: 1, 128>}, {pipeline_mode = #tpu.pipeline_mode<synchronous>, transform_indices = @transform_12, window_bounds = array<i64: 8, 1>}, {pipeline_mode = #tpu.pipeline_mode<synchronous>, transform_indices = @transform_13, window_bounds = array<i64: 8, 128>}, {pipeline_mode = #tpu.pipeline_mode<synchronous>, transform_indices = @transform_14, window_bounds = array<i64: 1, 1>}]} {
    %c0 = arith.constant 0 : index
    %c0_0 = arith.constant 0 : index
    %0 = vector.load %arg2[%c0, %c0_0] : memref<16x32xbf16, #tpu.memory_space<vmem>>, vector<16x32xbf16>
    %c0_1 = arith.constant 0 : index
    %c0_2 = arith.constant 0 : index
    %1 = vector.load %arg3[%c0_1, %c0_2] : memref<32x128xbf16, #tpu.memory_space<vmem>>, vector<32x128xbf16>
    %cst = arith.constant dense<0.000000e+00> : vector<16x128xf32>
    %2 = tpu.matmul %0, %1, %cst {dimension_numbers = #tpu.dot_dimension_numbers<[1], [0], [0], [1], [0, 0, 1, 1], [], []>} : vector<16x32xbf16>, vector<32x128xbf16>, vector<16x128xf32> -> vector<16x128xf32>
    %c0_3 = arith.constant 0 : index
    %c0_4 = arith.constant 0 : index
    %3 = vector.load %arg4[%c0_3, %c0_4] : memref<1x128xf32, #tpu.memory_space<vmem>>, vector<1x128xf32>
    %4 = vector.broadcast %3 : vector<1x128xf32> to vector<16x128xf32>
    %5 = arith.addf %2, %4 : vector<16x128xf32>
    %c0_5 = arith.constant 0 : index
    %c0_6 = arith.constant 0 : index
    %6 = vector.load %arg1[%c0_5, %c0_6] : memref<16x16xbf16, #tpu.memory_space<vmem>>, vector<16x16xbf16>
    %7 = arith.truncf %5 : vector<16x128xf32> to vector<16x128xbf16>
    %cst_7 = arith.constant dense<0.000000e+00> : vector<16x128xf32>
    %8 = tpu.matmul %6, %7, %cst_7 {dimension_numbers = #tpu.dot_dimension_numbers<[1], [0], [0], [1], [0, 0, 1, 1], [], []>} : vector<16x16xbf16>, vector<16x128xbf16>, vector<16x128xf32> -> vector<16x128xf32>
    %9 = arith.truncf %8 : vector<16x128xf32> to vector<16x128xbf16>
    %10 = tpu.iota {dimensions = array<i32: 1>} : vector<16x16xi32>
    %c0_8 = arith.constant 0 : index
    %c0_9 = arith.constant 0 : index
    %11 = vector.load %arg5[%c0_8, %c0_9] : memref<16x1xi32, #tpu.memory_space<vmem>>, vector<16x1xi32>
    %12 = vector.broadcast %11 : vector<16x1xi32> to vector<16x16xi32>
    %13 = arith.cmpi eq, %10, %12 : vector<16x16xi32>
    %cst_10 = arith.constant 1.000000e+00 : f32
    %cst_11 = arith.constant 0.000000e+00 : f32
    %14 = vector.broadcast %cst_10 : f32 to vector<16x16xf32>
    %15 = vector.broadcast %cst_11 : f32 to vector<16x16xf32>
    %16 = arith.select %13, %14, %15 : vector<16x16xi1>, vector<16x16xf32>
    %17 = arith.truncf %16 : vector<16x16xf32> to vector<16x16xbf16>
    %cst_12 = arith.constant dense<0.000000e+00> : vector<16x128xf32>
    %18 = tpu.matmul %17, %9, %cst_12 {dimension_numbers = #tpu.dot_dimension_numbers<[1], [0], [0], [1], [0, 0, 1, 1], [], []>} : vector<16x16xbf16>, vector<16x128xbf16>, vector<16x128xf32> -> vector<16x128xf32>
    %19 = vector.extract_strided_slice %18 {offsets = [0, 0], sizes = [8, 128], strides = [1, 1]} : vector<16x128xf32> to vector<8x128xf32>
    %20 = vector.extract_strided_slice %18 {offsets = [8, 0], sizes = [8, 128], strides = [1, 1]} : vector<16x128xf32> to vector<8x128xf32>
    %21 = tpu.iota {dimensions = array<i32: 1>} : vector<64x64xi32>
    %c0_13 = arith.constant 0 : index
    %c0_14 = arith.constant 0 : index
    %22 = vector.load %arg6[%c0_13, %c0_14] : memref<64x1xi32, #tpu.memory_space<vmem>>, vector<64x1xi32>
    %23 = vector.broadcast %22 : vector<64x1xi32> to vector<64x64xi32>
    %24 = arith.cmpi eq, %21, %23 : vector<64x64xi32>
    %c0_15 = arith.constant 0 : index
    %c0_16 = arith.constant 0 : index
    %25 = vector.load %arg7[%c0_15, %c0_16] : memref<64x1xf32, #tpu.memory_space<vmem>>, vector<64x1xf32>
    %cst_17 = arith.constant 0.000000e+00 : f32
    %26 = vector.shape_cast %25 : vector<64x1xf32> to vector<64x1xf32>
    %27 = vector.broadcast %26 : vector<64x1xf32> to vector<64x64xf32>
    %28 = vector.broadcast %cst_17 : f32 to vector<64x64xf32>
    %29 = arith.select %24, %27, %28 : vector<64x64xi1>, vector<64x64xf32>
    %30 = arith.truncf %29 : vector<64x64xf32> to vector<64x64xbf16>
    %c0_18 = arith.constant 0 : index
    %c0_19 = arith.constant 0 : index
    %31 = vector.load %arg8[%c0_18, %c0_19] : memref<64x128xbf16, #tpu.memory_space<vmem>>, vector<64x128xbf16>
    %cst_20 = arith.constant dense<0.000000e+00> : vector<64x128xf32>
    %32 = tpu.matmul %30, %31, %cst_20 {dimension_numbers = #tpu.dot_dimension_numbers<[1], [0], [0], [1], [0, 0, 1, 1], [], []>} : vector<64x64xbf16>, vector<64x128xbf16>, vector<64x128xf32> -> vector<64x128xf32>
    %33 = tpu.iota {dimensions = array<i32: 0>} : vector<8x64xi32>
    %c8_i32 = arith.constant 8 : i32
    %34 = vector.broadcast %c8_i32 : i32 to vector<8x64xi32>
    %35 = arith.muli %33, %34 : vector<8x64xi32>
    %36 = tpu.iota {dimensions = array<i32: 1>} : vector<8x64xi32>
    %37 = arith.cmpi sge, %36, %35 : vector<8x64xi32>
    %c8_i32_21 = arith.constant 8 : i32
    %38 = vector.broadcast %c8_i32_21 : i32 to vector<8x64xi32>
    %39 = arith.addi %35, %38 : vector<8x64xi32>
    %40 = arith.cmpi slt, %36, %39 : vector<8x64xi32>
    %41 = arith.andi %37, %40 : vector<8x64xi1>
    %cst_22 = arith.constant 1.000000e+00 : f32
    %cst_23 = arith.constant 0.000000e+00 : f32
    %42 = vector.broadcast %cst_22 : f32 to vector<8x64xf32>
    %43 = vector.broadcast %cst_23 : f32 to vector<8x64xf32>
    %44 = arith.select %41, %42, %43 : vector<8x64xi1>, vector<8x64xf32>
    %45 = arith.truncf %44 : vector<8x64xf32> to vector<8x64xbf16>
    %46 = arith.truncf %32 : vector<64x128xf32> to vector<64x128xbf16>
    %cst_24 = arith.constant dense<0.000000e+00> : vector<8x128xf32>
    %47 = tpu.matmul %45, %46, %cst_24 {dimension_numbers = #tpu.dot_dimension_numbers<[1], [0], [0], [1], [0, 0, 1, 1], [], []>} : vector<8x64xbf16>, vector<64x128xbf16>, vector<8x128xf32> -> vector<8x128xf32>
    %c0_25 = arith.constant 0 : index
    %c0_26 = arith.constant 0 : index
    %48 = vector.load %arg7[%c0_25, %c0_26] : memref<64x1xf32, #tpu.memory_space<vmem>>, vector<64x1xf32>
    %49 = arith.truncf %48 : vector<64x1xf32> to vector<64x1xbf16>
    %cst_27 = arith.constant dense<0.000000e+00> : vector<8x1xf32>
    %50 = tpu.matmul %45, %49, %cst_27 {dimension_numbers = #tpu.dot_dimension_numbers<[1], [0], [0], [1], [0, 0, 1, 1], [], []>} : vector<8x64xbf16>, vector<64x1xbf16>, vector<8x1xf32> -> vector<8x1xf32>
    %cst_28 = arith.constant 1.000000e+00 : f32
    %51 = vector.broadcast %cst_28 : f32 to vector<8x1xf32>
    %52 = arith.maximumf %50, %51 : vector<8x1xf32>
    %53 = tpu.reciprocal %52 : vector<8x1xf32> -> vector<8x1xf32>
    %54 = vector.broadcast %53 : vector<8x1xf32> to vector<8x128xf32>
    %55 = arith.mulf %47, %54 : vector<8x128xf32>
    %56 = arith.truncf %55 : vector<8x128xf32> to vector<8x128xbf16>
    %c0_29 = arith.constant 0 : index
    %c0_30 = arith.constant 0 : index
    %57 = vector.load %arg9[%c0_29, %c0_30] : memref<128x128xbf16, #tpu.memory_space<vmem>>, vector<128x128xbf16>
    %cst_31 = arith.constant dense<0.000000e+00> : vector<8x128xf32>
    %58 = tpu.matmul %56, %57, %cst_31 {dimension_numbers = #tpu.dot_dimension_numbers<[1], [0], [0], [1], [0, 0, 1, 1], [], []>} : vector<8x128xbf16>, vector<128x128xbf16>, vector<8x128xf32> -> vector<8x128xf32>
    %c0_32 = arith.constant 0 : index
    %c0_33 = arith.constant 0 : index
    %59 = vector.load %arg10[%c0_32, %c0_33] : memref<1x128xf32, #tpu.memory_space<vmem>>, vector<1x128xf32>
    %60 = vector.broadcast %59 : vector<1x128xf32> to vector<8x128xf32>
    %61 = arith.addf %58, %60 : vector<8x128xf32>
    %62 = math.tanh %61 : vector<8x128xf32>
    %63 = tpu.concatenate %19, %20, %62 in 1 : vector<8x128xf32>, vector<8x128xf32>, vector<8x128xf32> -> vector<8x384xf32>
    %64 = arith.truncf %63 : vector<8x384xf32> to vector<8x384xbf16>
    %c0_34 = arith.constant 0 : index
    %c0_35 = arith.constant 0 : index
    %65 = vector.load %arg11[%c0_34, %c0_35] : memref<384x128xbf16, #tpu.memory_space<vmem>>, vector<384x128xbf16>
    %cst_36 = arith.constant dense<0.000000e+00> : vector<8x128xf32>
    %66 = tpu.matmul %64, %65, %cst_36 {dimension_numbers = #tpu.dot_dimension_numbers<[1], [0], [0], [1], [0, 0, 1, 1], [], []>} : vector<8x384xbf16>, vector<384x128xbf16>, vector<8x128xf32> -> vector<8x128xf32>
    %c0_37 = arith.constant 0 : index
    %c0_38 = arith.constant 0 : index
    %67 = vector.load %arg12[%c0_37, %c0_38] : memref<1x128xf32, #tpu.memory_space<vmem>>, vector<1x128xf32>
    %68 = vector.broadcast %67 : vector<1x128xf32> to vector<8x128xf32>
    %69 = arith.addf %66, %68 : vector<8x128xf32>
    %c0_39 = arith.constant 0 : index
    %c0_40 = arith.constant 0 : index
    %70 = vector.load %arg14[%c0_39, %c0_40] : memref<8x128xf32, #tpu.memory_space<vmem>>, vector<8x128xf32>
    tpu.vector_store %arg14[%c0_39, %c0_40], %69 {strides = array<i32>} : memref<8x128xf32, #tpu.memory_space<vmem>>, vector<8x128xf32>,
    %cst_41 = arith.constant dense<0xFF800000> : vector<8xf32>
    %71 = vector.multi_reduction <maximumf>, %69, %cst_41 [1] : vector<8x128xf32> to vector<8xf32>
    %72 = vector.shape_cast %71 : vector<8xf32> to vector<8x1xf32>
    %73 = vector.broadcast %72 : vector<8x1xf32> to vector<8x128xf32>
    %74 = arith.subf %69, %73 : vector<8x128xf32>
    %75 = math.exp %74 : vector<8x128xf32>
    %cst_42 = arith.constant dense<0.000000e+00> : vector<8xf32>
    %76 = vector.multi_reduction <add>, %75, %cst_42 [1] : vector<8x128xf32> to vector<8xf32>
    %77 = vector.shape_cast %76 : vector<8xf32> to vector<8x1xf32>
    %78 = math.log %77 : vector<8x1xf32>
    %79 = arith.addf %72, %78 : vector<8x1xf32>
    %80 = tpu.iota {dimensions = array<i32: 1>} : vector<8x128xi32>
    %c0_43 = arith.constant 0 : index
    %c0_44 = arith.constant 0 : index
    %81 = vector.load %arg13[%c0_43, %c0_44] : memref<8x1xi32, #tpu.memory_space<vmem>>, vector<8x1xi32>
    %82 = vector.broadcast %81 : vector<8x1xi32> to vector<8x128xi32>
    %83 = arith.cmpi eq, %80, %82 : vector<8x128xi32>
    %cst_45 = arith.constant 1.000000e+00 : f32
    %cst_46 = arith.constant 0.000000e+00 : f32
    %84 = vector.broadcast %cst_45 : f32 to vector<8x128xf32>
    %85 = vector.broadcast %cst_46 : f32 to vector<8x128xf32>
    %86 = arith.select %83, %84, %85 : vector<8x128xi1>, vector<8x128xf32>
    %87 = arith.mulf %86, %69 : vector<8x128xf32>
    %cst_47 = arith.constant dense<0.000000e+00> : vector<8xf32>
    %88 = vector.multi_reduction <add>, %87, %cst_47 [1] : vector<8x128xf32> to vector<8xf32>
    %89 = vector.shape_cast %88 : vector<8xf32> to vector<8x1xf32>
    %90 = arith.subf %79, %89 : vector<8x1xf32>
    %cst_48 = arith.constant dense<0.000000e+00> : vector<1xf32>
    %91 = vector.multi_reduction <add>, %90, %cst_48 [0] : vector<8x1xf32> to vector<1xf32>
    %92 = vector.shape_cast %91 : vector<1xf32> to vector<1x1xf32>
    %cst_49 = arith.constant 1.250000e-01 : f32
    %93 = vector.broadcast %cst_49 : f32 to vector<1x1xf32>
    %94 = arith.mulf %92, %93 : vector<1x1xf32>
    %c0_50 = arith.constant 0 : index
    %c0_51 = arith.constant 0 : index
    %95 = vector.load %arg15[%c0_50, %c0_51] : memref<1x1xf32, #tpu.memory_space<vmem>>, vector<1x1xf32>
    tpu.vector_store %arg15[%c0_50, %c0_51], %94 {strides = array<i32>} : memref<1x1xf32, #tpu.memory_space<vmem>>, vector<1x1xf32>,
    return
  }
  func.func @transform_0(%arg0: i32) -> (i32, i32) {
    %c0_i32 = arith.constant 0 : i32
    %c0_i32_0 = arith.constant 0 : i32
    %c0_i32_1 = arith.constant 0 : i32
    return %c0_i32, %c0_i32_0 : i32, i32
  }
  func.func @transform_1(%arg0: i32) -> (i32, i32) {
    %c0_i32 = arith.constant 0 : i32
    %c0_i32_0 = arith.constant 0 : i32
    %c0_i32_1 = arith.constant 0 : i32
    return %c0_i32, %c0_i32_0 : i32, i32
  }
  func.func @transform_2(%arg0: i32) -> (i32, i32) {
    %c0_i32 = arith.constant 0 : i32
    %c0_i32_0 = arith.constant 0 : i32
    %c0_i32_1 = arith.constant 0 : i32
    return %c0_i32, %c0_i32_0 : i32, i32
  }
  func.func @transform_3(%arg0: i32) -> (i32, i32) {
    %c0_i32 = arith.constant 0 : i32
    %c0_i32_0 = arith.constant 0 : i32
    %c0_i32_1 = arith.constant 0 : i32
    return %c0_i32, %c0_i32_0 : i32, i32
  }
  func.func @transform_4(%arg0: i32) -> (i32, i32) {
    %c0_i32 = arith.constant 0 : i32
    %c0_i32_0 = arith.constant 0 : i32
    %c0_i32_1 = arith.constant 0 : i32
    return %c0_i32, %c0_i32_0 : i32, i32
  }
  func.func @transform_5(%arg0: i32) -> (i32, i32) {
    %c0_i32 = arith.constant 0 : i32
    %c0_i32_0 = arith.constant 0 : i32
    %c0_i32_1 = arith.constant 0 : i32
    return %c0_i32, %c0_i32_0 : i32, i32
  }
  func.func @transform_6(%arg0: i32) -> (i32, i32) {
    %c0_i32 = arith.constant 0 : i32
    %c0_i32_0 = arith.constant 0 : i32
    %c0_i32_1 = arith.constant 0 : i32
    return %c0_i32, %c0_i32_0 : i32, i32
  }
  func.func @transform_7(%arg0: i32) -> (i32, i32) {
    %c0_i32 = arith.constant 0 : i32
    %c0_i32_0 = arith.constant 0 : i32
    %c0_i32_1 = arith.constant 0 : i32
    return %c0_i32, %c0_i32_0 : i32, i32
  }
  func.func @transform_8(%arg0: i32) -> (i32, i32) {
    %c0_i32 = arith.constant 0 : i32
    %c0_i32_0 = arith.constant 0 : i32
    %c0_i32_1 = arith.constant 0 : i32
    return %c0_i32, %c0_i32_0 : i32, i32
  }
  func.func @transform_9(%arg0: i32) -> (i32, i32) {
    %c0_i32 = arith.constant 0 : i32
    %c0_i32_0 = arith.constant 0 : i32
    %c0_i32_1 = arith.constant 0 : i32
    return %c0_i32, %c0_i32_0 : i32, i32
  }
  func.func @transform_10(%arg0: i32) -> (i32, i32) {
    %c0_i32 = arith.constant 0 : i32
    %c0_i32_0 = arith.constant 0 : i32
    %c0_i32_1 = arith.constant 0 : i32
    return %c0_i32, %c0_i32_0 : i32, i32
  }
  func.func @transform_11(%arg0: i32) -> (i32, i32) {
    %c0_i32 = arith.constant 0 : i32
    %c0_i32_0 = arith.constant 0 : i32
    %c0_i32_1 = arith.constant 0 : i32
    return %c0_i32, %c0_i32_0 : i32, i32
  }
  func.func @transform_12(%arg0: i32) -> (i32, i32) {
    %c0_i32 = arith.constant 0 : i32
    %c0_i32_0 = arith.constant 0 : i32
    %c0_i32_1 = arith.constant 0 : i32
    return %c0_i32, %c0_i32_0 : i32, i32
  }
  func.func @transform_13(%arg0: i32) -> (i32, i32) {
    %c0_i32 = arith.constant 0 : i32
    %c0_i32_0 = arith.constant 0 : i32
    %c0_i32_1 = arith.constant 0 : i32
    return %c0_i32, %c0_i32_0 : i32, i32
  }
  func.func @transform_14(%arg0: i32) -> (i32, i32) {
    %c0_i32 = arith.constant 0 : i32
    %c0_i32_0 = arith.constant 0 : i32
    %c0_i32_1 = arith.constant 0 : i32
    return %c0_i32, %c0_i32_0 : i32, i32
  }
}

</mosaic_0001>

<bundles_post_ra>
// kernel: mul.1
= control target key start
LH: loop header
LB: loop body
LE: loop exit
PB: predicated region body
PF: predicated region fallthrough
CT: control target
= control target key end

     0   :  { %s34_s0 = inlined_call_operand.vmem [shape: f32[24], index: 0, kind: input, shape index: {}]   ;;  %s35_s1 = inlined_call_operand.vmem [shape: f32[24], index: 1, kind: input, shape index: {}]   ;;  %s36_s2 = inlined_call_operand.vmem [shape: f32[24], index: 2, kind: output, shape index: {}]  }
   0x1   :  { %v3_v0 = vld [vmem:[%s34_s0] sm:$0x1] }
   0x2   :  { %v4_v1 = vld [vmem:[%s35_s1] sm:$0x1] }
   0x3   :  { %v7_v2 = vmul.f32 %v4_v1, %v3_v0 }
   0x5   :  { %9 = vst [vmem:[%s36_s2] sm:$0x1] %v7_v2 }

// kernel: squeeze.0
= control target key start
LH: loop header
LB: loop body
LE: loop exit
PB: predicated region body
PF: predicated region fallthrough
CT: control target
= control target key end

     0   :  { %vm3_vm0 = vcmask 7168   ;;  %s84_s8 = smov 125   ;;  %s85_s13 = smov 126   ;;  %s167_s0 = inlined_call_operand.vmem [shape: s32[8,8], index: 0, kind: input, shape index: {}]   ;;  %s168_s1 = inlined_call_operand.vmem [shape: s32[64,1], index: 1, kind: output, shape index: {}]  }
   0x1   :  { %v6_v0 = vld [vmem:[%s167_s0] sm:$0xff]   ;;  %s83_s0 = smov 127   ;;  %s86_s14 = smov 124  }
   0x2   :  { %7 = vrot.lane.b32.xlu0 %v6_v0, %s83_s0  ;;  %23 = vrot.lane.b32.xlu1 %v6_v0, %s84_s8  ;;  %4 = vst.msk [vmem:[%s168_s1] ss:$8 sm:$0xf] %vm3_vm0, %v6_v0   ;;  %5 = vst.msk [vmem:[%s168_s1] ss:$8 sm:$0xf0] %vm3_vm0, %v6_v0  }
   0x3   :  { %s87_s15 = smov 123   ;;  %s88_s16 = smov 122  }
   0x4   :  { %s89_s17 = smov 121  }
   0x6   :  { %15 = vrot.lane.b32.xlu0 %v6_v0, %s85_s13  ;;  %31 = vrot.lane.b32.xlu1 %v6_v0, %s86_s14 }
   0xa   :  { %39 = vrot.lane.b32.xlu0 %v6_v0, %s87_s15  ;;  %47 = vrot.lane.b32.xlu1 %v6_v0, %s88_s16 }
   0xe   :  { %55 = vrot.lane.b32.xlu0 %v6_v0, %s89_s17 }
  0x74   :  { %v8_v1 = vpop.permute.xlu0 %7   ;;  %v24_v2 = vpop.permute.xlu1 %23  }
  0x75   :  { %62 = vst.msk [vmem:[%s168_s1 + $0x1] ss:$8 sm:$0xf] %vm3_vm0, %v8_v1   ;;  %63 = vst.msk [vmem:[%s168_s1 + $0x1] ss:$8 sm:$0xf0] %vm3_vm0, %v8_v1  }
  0x76   :  { %66 = vst.msk [vmem:[%s168_s1 + $0x3] ss:$8 sm:$0xf] %vm3_vm0, %v24_v2   ;;  %67 = vst.msk [vmem:[%s168_s1 + $0x3] ss:$8 sm:$0xf0] %vm3_vm0, %v24_v2  }
  0x78   :  { %v16_v3 = vpop.permute.xlu0 %15   ;;  %v32_v4 = vpop.permute.xlu1 %31  }
  0x79   :  { %64 = vst.msk [vmem:[%s168_s1 + $0x2] ss:$8 sm:$0xf] %vm3_vm0, %v16_v3   ;;  %65 = vst.msk [vmem:[%s168_s1 + $0x2] ss:$8 sm:$0xf0] %vm3_vm0, %v16_v3  }
  0x7a   :  { %68 = vst.msk [vmem:[%s168_s1 + $0x4] ss:$8 sm:$0xf] %vm3_vm0, %v32_v4   ;;  %69 = vst.msk [vmem:[%s168_s1 + $0x4] ss:$8 sm:$0xf0] %vm3_vm0, %v32_v4  }
  0x7c   :  { %v40_v5 = vpop.permute.xlu0 %39   ;;  %v48_v6 = vpop.permute.xlu1 %47  }
  0x7d   :  { %70 = vst.msk [vmem:[%s168_s1 + $0x5] ss:$8 sm:$0xf] %vm3_vm0, %v40_v5   ;;  %71 = vst.msk [vmem:[%s168_s1 + $0x5] ss:$8 sm:$0xf0] %vm3_vm0, %v40_v5  }
  0x7e   :  { %72 = vst.msk [vmem:[%s168_s1 + $0x6] ss:$8 sm:$0xf] %vm3_vm0, %v48_v6   ;;  %73 = vst.msk [vmem:[%s168_s1 + $0x6] ss:$8 sm:$0xf0] %vm3_vm0, %v48_v6  }
  0x80   :  { %v56_v7 = vpop.permute.xlu0 %55  }
  0x81   :  { %74 = vst.msk [vmem:[%s168_s1 + $0x7] ss:$8 sm:$0xf] %vm3_vm0, %v56_v7   ;;  %75 = vst.msk [vmem:[%s168_s1 + $0x7] ss:$8 sm:$0xf0] %vm3_vm0, %v56_v7  }

// kernel: sengraph_forward.1
= control target key start
LH: loop header
LB: loop body
LE: loop exit
PB: predicated region body
PF: predicated region fallthrough
CT: control target
= control target key end

     0   :  { %v1312_v1 = vmov 0.0   ;;  %vm1313_vm0 = vmmov 0   ;;  %v1314_v5 = vmov 0   ;;  %vm78_vm1 = vcmask 261120   ;;  %s1705_s0 = inlined_call_operand.vmem [shape: bf16[16,16], index: 0, kind: input, shape index: {}]   ;;  %s1706_s1 = inlined_call_operand.vmem [shape: bf16[16,32], index: 1, kind: input, shape index: {}]   ;;  %s1707_s2 = inlined_call_operand.vmem [shape: bf16[32,128], index: 2, kind: input, shape index: {}]   ;;  %s1708_s3 = inlined_call_operand.vmem [shape: f32[1,128], index: 3, kind: input, shape index: {}]   ;;  %s1709_s4 = inlined_call_operand.vmem [shape: s32[16,1], index: 4, kind: input, shape index: {}]   ;;  %s1710_s5 = inlined_call_operand.vmem [shape: s32[64,1], index: 5, kind: input, shape index: {}]   ;;  %s1711_s6 = inlined_call_operand.vmem [shape: f32[64,1], index: 6, kind: input, shape index: {}]   ;;  %s1712_s7 = inlined_call_operand.vmem [shape: bf16[64,128], index: 7, kind: input, shape index: {}]   ;;  %s1713_s8 = inlined_call_operand.vmem [shape: bf16[128,128], index: 8, kind: input, shape index: {}]   ;;  %s1714_s9 = inlined_call_operand.vmem [shape: f32[1,128], index: 9, kind: input, shape index: {}]   ;;  %s1715_s10 = inlined_call_operand.vmem [shape: bf16[384,128], index: 10, kind: input, shape index: {}]   ;;  %s1716_s11 = inlined_call_operand.vmem [shape: f32[1,128], index: 11, kind: input, shape index: {}]   ;;  %s1717_s12 = inlined_call_operand.vmem [shape: s32[8,1], index: 12, kind: input, shape index: {}]   ;;  %s1718_s13 = inlined_call_operand.vmem [shape: f32[8,128], index: 13, kind: output, shape index: {0}]   ;;  %s1719_s14 = inlined_call_operand.hbm [shape: f32[1,1], index: 14, kind: output, shape index: {1}]  }
   0x1   :  { %v1240_v0 = vld [vmem:[%s1707_s2] sm:$0xff]   ;;  %1114 = vmatprep.subr.bf16.mxu0 %v1312_v1  ;;  %1128 = vmatprep.subr.bf16.mxu1 %v1312_v1  ;;  %v1241_v2 = vld [vmem:[%s1707_s2 + $0x8] sm:$0xff]   ;;  %v238_v3 = vld [vmem:[%s1710_s5 + $0x10] sm:$0xff] }
   0x2   :  { %1115 = vmatpush3.bf16.msra.mxu0 %v1240_v0  ;;  %1118 = vmatprep.mubr.msk.bf16.mxu0 %vm1313_vm0, %v1312_v1  ;;  %v236_v4 = vld [vmem:[%s1710_s5] sm:$0xff]  ;;  %v1413_v6 = vld [vmem:[%s1711_s6 + $0x10] sm:$0xff]  ;;  %v1418_v7 = vld [vmem:[%s1711_s6 + $0x18] sm:$0xff] }
   0x3   :  { %1116 = vmatprep.subr.bf16.mxu0 %v1312_v1  ;;  %1130 = vmatprep.mubr.msk.bf16.mxu1 %vm1313_vm0, %v1312_v1  ;;  %v1242_v8 = vld [vmem:[%s1706_s1] sm:$0xff]   ;;  %v503_v9 = vpack.c.bf16 %v1418_v7, %v1413_v6  ;;  %v1433_v11 = vld [vmem:[%s1711_s6 + $0x8] sm:$0xff]  ;;  %v239_v12 = vld [vmem:[%s1710_s5 + $0x18] sm:$0xff]  ;;  %v1225_v20 = vpack.i.bf16 %v1418_v7, %v1413_v6 }
   0x4   :  { %1219 = vset.pattern.permute.xlu1 %v1314_v5  ;;  %1218 = vset.pattern.permute.xlu0 %v1314_v5  ;;  %v1428_v10 = vld [vmem:[%s1711_s6] sm:$0xff]  ;;  %v237_v14 = vld [vmem:[%s1710_s5 + $0x8] sm:$0xff]  ;;  %v1446_v15 = vld [vmem:[%s1711_s6 + $0x30] sm:$0xff] }
   0x5   :  { %251 = vperm.xlu1 %1219, %v238_v3   ;;  %245 = vperm.xlu0 %1218, %v236_v4   ;;  %v502_v13 = vpack.c.bf16 %v1433_v11, %v1428_v10  ;;  %v1451_v16 = vld [vmem:[%s1711_s6 + $0x38] sm:$0xff]  ;;  %v1459_v18 = vld [vmem:[%s1711_s6 + $0x20] sm:$0xff]  ;;  %v1464_v19 = vld [vmem:[%s1711_s6 + $0x28] sm:$0xff]  ;;  %v1220_v22 = vpack.i.bf16 %v1433_v11, %v1428_v10 }
   0x6   :  { %1117 = vmatpush3.bf16.msra.mxu0 %v1241_v2  ;;  %v505_v17 = vpack.c.bf16 %v1451_v16, %v1446_v15  ;;  %v504_v21 = vpack.c.bf16 %v1464_v19, %v1459_v18  ;;  %v241_v23 = vld [vmem:[%s1710_s5 + $0x28] sm:$0xff]  ;;  %v240_v24 = vld [vmem:[%s1710_s5 + $0x20] sm:$0xff]  ;;  %v243_v25 = vld [vmem:[%s1710_s5 + $0x38] sm:$0xff]  ;;  %v1235_v27 = vpack.i.bf16 %v1451_v16, %v1446_v15  ;;  %v1230_v28 = vpack.i.bf16 %v1464_v19, %v1459_v18 }
   0x7   :  { %1122 = vmatprep.subr.bf16.mxu0 %v1312_v1  ;;  %v242_v26 = vld [vmem:[%s1710_s5 + $0x30] sm:$0xff]  ;;  %v180_v29 = vld [vmem:[%s1709_s4 + $0x8] sm:$0xff]  ;;  %v179_v30 = vld [vmem:[%s1709_s4] sm:$0xff] }
   0x9   :  { %1119 = vmatmul.mubr.msk.bf16.vlgmr.msra.gmra.mrb[0].mxu0 %vm78_vm1, %v1242_v8  ;;  %254 = vperm.xlu1 %1219, %v239_v12  }
   0xa   :  { %248 = vperm.xlu0 %1218, %v237_v14   ;;  %1124 = vmatprep.mubr.msk.bf16.mxu0 %vm1313_vm0, %v1312_v1 }
   0xd   :  { %1226 = vperm.xlu1 %1219, %v1225_v20  }
   0xe   :  { %1221 = vperm.xlu0 %1218, %v1220_v22  }
  0x11   :  { %260 = vperm.xlu1 %1219, %v241_v23  }
  0x12   :  { %257 = vperm.xlu0 %1218, %v240_v24  }
  0x15   :  { %266 = vperm.xlu1 %1219, %v243_v25  }
  0x16   :  { %263 = vperm.xlu0 %1218, %v242_v26  }
  0x19   :  { %1236 = vperm.xlu1 %1219, %v1235_v27  }
  0x1a   :  { %1231 = vperm.xlu0 %1218, %v1230_v28  }
  0x1d   :  { %185 = vperm.xlu1 %1219, %v180_v29  }
  0x1e   :  { %182 = vperm.xlu0 %1218, %v179_v30  }
  0x1f   :  { %20 = vsyncpa [#allocation3], 0  ;;  %v177_v32 = vlaneseq  ;;  %v997_v40 = vld [vmem:[%s1708_s3] ss:$0 sm:$0xff]  ;;  %vm131_vm4 = vcmask 130048   ;;  %v1245_v55 = vld [vmem:[%s1712_s7 + $0x8] sm:$0xff]  }
  0x20   :  { %v1244_v49 = vld [vmem:[%s1712_s7] sm:$0xff]   ;;  %vm368_vm5 = vcmask 523264   ;;  %v1246_v58 = vld [vmem:[%s1712_s7 + $0x10] sm:$0xff]   ;;  %v1247_v59 = vld [vmem:[%s1712_s7 + $0x18] sm:$0xff]  }
  0x21   :  { %v1496_v35 = vand.u32 127, %v177_v32  ;;  %v1243_v53 = vld [vmem:[%s1705_s0] sm:$0xff]   ;;  %v447_v63 = vshrl.u32 %v177_v32, 7 }
  0x23   :  { %v448_v8 = vmul.u32 8, %v447_v63  ;;  %v1261_v63 = vld [vmem:[%s1715_s10 + $0x30] sm:$0xff]  }
  0x25   :  { %v450_v26 = vadd.s32 8, %v448_v8  ;;  %vm449_vm12 = vcmp.ge.s32.totalorder %v1496_v35, %v448_v8  ;;  %v1267_v8 = vld [vmem:[%s1713_s8 + $0x18] sm:$0xff]  }
  0x27   :  { %vm451_vm13 = vcmp.lt.s32.totalorder %v1496_v35, %v450_v26 }
  0x28   :  { %vm452_vm14 = vmand %vm449_vm12, %vm451_vm13 }
  0x29   :  { %v453_v10 = vsel %vm452_vm14, 1.0, %v1312_v1 }
  0x2a   :  { %v454_v11 = vpack.c.bf16 %v453_v10, %v453_v10 }
  0x84   :  { %v246_v31 = vpop.permute.xlu0 %245  ;;  %v252_v34 = vpop.permute.xlu1 %251 }
  0x85   :  { %vm268_vm2 = vcmp.eq.s32.totalorder %v1496_v35, %v246_v31  ;;  %vm270_vm6 = vcmp.eq.s32.totalorder %v1496_v35, %v252_v34 }
  0x88   :  { %v255_v37 = vpop.permute.xlu1 %254 }
  0x89   :  { %v249_v33 = vpop.permute.xlu0 %248  ;;  %vm271_vm7 = vcmp.eq.s32.totalorder %v1496_v35, %v255_v37 }
  0x8a   :  { %vm269_vm3 = vcmp.eq.s32.totalorder %v1496_v35, %v249_v33 }
  0x8c   :  { %v1227_v52 = vpop.permute.xlu1 %1226 }
  0x8d   :  { %v1222_v36 = vpop.permute.xlu0 %1221  ;;  %v1229_v60 = vunpack.i.h.bf16 %v1227_v52  ;;  %v1228_v61 = vunpack.i.l.bf16 %v1227_v52  ;;  %v1250_v52 = vld [vmem:[%s1715_s10 + $0x48] sm:$0xff]  }
  0x8e   :  { %v1224_v38 = vunpack.i.h.bf16 %v1222_v36  ;;  %v1223_v39 = vunpack.i.l.bf16 %v1222_v36 }
  0x8f   :  { %v326_v4 = vsel %vm270_vm6, %v1228_v61, 0.0  ;;  %v327_v5 = vsel %vm271_vm7, %v1229_v60, 0.0  ;;  %v1258_v60 = vld [vmem:[%s1715_s10 + $0x68] sm:$0xff]  }
  0x90   :  { %v324_v47 = vsel %vm268_vm2, %v1223_v39, 0.0  ;;  %v325_v48 = vsel %vm269_vm3, %v1224_v38, 0.0  ;;  %v261_v57 = vpop.permute.xlu1 %260  ;;  %v333_v20 = vpack.c.bf16 %v327_v5, %v326_v4  ;;  %v1259_v61 = vld [vmem:[%s1715_s10 + $0x28] sm:$0xff]   ;;  %v1266_v5 = vld [vmem:[%s1713_s8 + $0x10] sm:$0xff]   ;;  %vm977_vm2 = vcmask 0  }
  0x91   :  { %v258_v50 = vpop.permute.xlu0 %257  ;;  %v332_v54 = vpack.c.bf16 %v325_v48, %v324_v47  ;;  %vm273_vm8 = vcmp.eq.s32.totalorder %v1496_v35, %v261_v57  ;;  %v1255_v57 = vld [vmem:[%s1715_s10 + $0x18] sm:$0xff]   ;;  %v1265_v4 = vld [vmem:[%s1713_s8 + $0x8] sm:$0xff]  }
  0x92   :  { %vm272_vm9 = vcmp.eq.s32.totalorder %v1496_v35, %v258_v50  ;;  %v1248_v50 = vld [vmem:[%s1715_s10 + $0x40] sm:$0xff]  }
  0x94   :  { %v267_v0 = vpop.permute.xlu1 %266 }
  0x95   :  { %v264_v56 = vpop.permute.xlu0 %263  ;;  %vm275_vm10 = vcmp.eq.s32.totalorder %v1496_v35, %v267_v0  ;;  %v1262_v0 = vld [vmem:[%s1715_s10 + $0x78] sm:$0xff]  }
  0x96   :  { %vm274_vm11 = vcmp.eq.s32.totalorder %v1496_v35, %v264_v56  ;;  %v1254_v56 = vld [vmem:[%s1715_s10 + $0x58] sm:$0xff]  }
  0x98   :  { %v1237_v22 = vpop.permute.xlu1 %1236 }
  0x99   :  { %v1232_v62 = vpop.permute.xlu0 %1231  ;;  %v1239_v23 = vunpack.i.h.bf16 %v1237_v22  ;;  %v1238_v24 = vunpack.i.l.bf16 %v1237_v22  ;;  %v1271_v22 = vld [vmem:[%s1713_s8 + $0x38] sm:$0xff]  }
  0x9a   :  { %v1234_v2 = vunpack.i.h.bf16 %v1232_v62  ;;  %v1233_v3 = vunpack.i.l.bf16 %v1232_v62  ;;  %v1260_v62 = vld [vmem:[%s1715_s10 + $0x70] sm:$0xff]  }
  0x9b   :  { %v330_v27 = vsel %vm274_vm11, %v1238_v24, 0.0  ;;  %v331_v28 = vsel %vm275_vm10, %v1239_v23, 0.0 }
  0x9c   :  { %v328_v12 = vsel %vm272_vm9, %v1233_v3, 0.0  ;;  %v329_v14 = vsel %vm273_vm8, %v1234_v2, 0.0  ;;  %v335_v29 = vpack.c.bf16 %v331_v28, %v330_v27  ;;  %v186_v6 = vpop.permute.xlu1 %185  ;;  %v1263_v2 = vld [vmem:[%s1713_s8] sm:$0xff]   ;;  %v1264_v3 = vld [vmem:[%s1715_s10 + $0x38] sm:$0xff]  }
  0x9d   :  { %v334_v25 = vpack.c.bf16 %v329_v14, %v328_v12  ;;  %v183_v7 = vpop.permute.xlu0 %182  ;;  %vm188_vm15 = vcmp.eq.s32.totalorder %v1496_v35, %v186_v6  ;;  %v1268_v12 = vld [vmem:[%s1713_s8 + $0x20] sm:$0xff]   ;;  %v1269_v14 = vld [vmem:[%s1713_s8 + $0x28] sm:$0xff]  }
  0x9e   :  { %vm187_vm1 = vcmp.eq.s32.totalorder %v1496_v35, %v183_v7  ;;  %v190_v19 = vsel %vm188_vm15, 1.0, %v1312_v1 }
  0xdc   :  { %v116_v41 = vpop.f32.mrb[0].mxu0 }
  0xdd   :  { %v1120_v42 = vpop.f32.mrb[1].mxu0  ;;  %v117_v44 = vadd.f32 %v997_v40, %v116_v41 }
  0xde   :  { %v119_v43 = vpop.f32.mrb[2].mxu0 }
  0xdf   :  { %v120_v45 = vadd.f32 %v997_v40, %v119_v43  ;;  %v1121_v46 = vpop.f32.mrb[3].mxu0 }
  0xe1   :  { %v125_v51 = vpack.c.bf16 %v120_v45, %v117_v44 }
  0xe3   :  { %1123 = vmatpush3.bf16.msra.mxu0 %v125_v51  ;;  %v1249_v51 = vld [vmem:[%s1715_s10] sm:$0xff]  }
  0xe4   :  { %1134 = vmatprep.subr.bf16.mxu0 %v1244_v49 }
  0xe6   :  { %1125 = vmatmul.mubr.msk.bf16.vlgmr.msra.gmra.mrb[4].mxu0 %vm131_vm4, %v1243_v53  ;;  %v1251_v53 = vld [vmem:[%s1715_s10 + $0x8] sm:$0xff]  }
  0xe7   :  { %1135 = vmatpush3.bf16.msra.mxu0 %v1244_v49  ;;  %1142 = vmatprep.mubr.msk.bf16.mxu0 %vm368_vm5, %v332_v54  ;;  %v960_v49 = vld [vmem:[%s1717_s12] sm:$0xff]  ;;  %v1252_v54 = vld [vmem:[%s1715_s10 + $0x50] sm:$0xff]  }
  0xe8   :  { %1136 = vmatprep.subr.bf16.mxu0 %v1245_v55 }
  0xeb   :  { %1137 = vmatpush3.bf16.msra.mxu0 %v1245_v55  ;;  %v1253_v55 = vld [vmem:[%s1715_s10 + $0x10] sm:$0xff]  }
  0xec   :  { %1138 = vmatprep.subr.bf16.mxu0 %v1246_v58 }
  0xef   :  { %1139 = vmatpush3.bf16.msra.mxu0 %v1246_v58  ;;  %v1256_v58 = vld [vmem:[%s1715_s10 + $0x60] sm:$0xff]  }
  0xf0   :  { %1140 = vmatprep.subr.bf16.mxu0 %v1247_v59 }
  0xf3   :  { %1141 = vmatpush3.bf16.msra.mxu0 %v1247_v59  ;;  %v1257_v59 = vld [vmem:[%s1715_s10 + $0x20] sm:$0xff]  }
  0xf4   :  { %1162 = vmatprep.subr.bf16.mxu0 %v1312_v1 }
  0xf6   :  { %1143 = vmatmul.mubr.msk.bf16.vlgmr.msra.gmra.mrb[8].mxu0 %vm368_vm5, %v333_v20  ;;  %v1270_v20 = vld [vmem:[%s1713_s8 + $0x30] sm:$0xff]  }
  0xf7   :  { %1146 = vmatprep.mubr.msk.bf16.mxu0 %vm368_vm5, %v334_v25  ;;  %1163 = vmatpush3.bf16.msra.mxu0 %v502_v13 }
  0xf8   :  { %1164 = vmatprep.subr.bf16.mxu0 %v1312_v1 }
  0xfb   :  { %1165 = vmatpush3.bf16.msra.mxu0 %v503_v9 }
  0xfc   :  { %1166 = vmatprep.subr.bf16.mxu0 %v1312_v1 }
  0xfe   :  { %1147 = vmatmul.mubr.msk.bf16.gmra.mrb[12].mxu0 %vm368_vm5, %v335_v29 }
  0xff   :  { %1167 = vmatpush3.bf16.msra.mxu0 %v504_v21  ;;  %1170 = vmatprep.mubr.msk.bf16.mxu0 %vm1313_vm0, %v1312_v1  ;;  %v189_v21 = vsel %vm187_vm1, 1.0, %v1312_v1 }
 0x100   :  { %1168 = vmatprep.subr.bf16.mxu0 %v1312_v1  ;;  %v191_v15 = vpack.c.bf16 %v190_v19, %v189_v21  ;;  %v1273_v19 = vld [vmem:[%s1715_s10 + $0x88] sm:$0xff]   ;;  %v1274_v21 = vld [vmem:[%s1715_s10 + $0x90] sm:$0xff]  }
 0x103   :  { %1169 = vmatpush3.bf16.msra.mxu0 %v505_v17 }
 0x104   :  { %1083 = vmatprep.subr.bf16.mxu0 %v1248_v50 }
 0x106   :  { %1171 = vmatmul.mubr.msk.bf16.vlgmr.msra.gmra.mrb[16].mxu0 %vm368_vm5, %v454_v11 }
 0x107   :  { %1084 = vmatpush3.bf16.msra.mxu0 %v1249_v51 }
 0x108   :  { %1085 = vmatprep.subr.bf16.mxu0 %v1250_v52 }
 0x10b   :  { %1086 = vmatpush3.bf16.msra.mxu0 %v1251_v53 }
 0x10c   :  { %1087 = vmatprep.subr.bf16.mxu0 %v1252_v54 }
 0x10f   :  { %1088 = vmatpush3.bf16.msra.mxu0 %v1253_v55 }
 0x110   :  { %1089 = vmatprep.subr.bf16.mxu0 %v1254_v56 }
 0x113   :  { %1090 = vmatpush3.bf16.msra.mxu0 %v1255_v57 }
 0x114   :  { %1091 = vmatprep.subr.bf16.mxu0 %v1256_v58 }
 0x117   :  { %1092 = vmatpush3.bf16.msra.mxu0 %v1257_v59 }
 0x118   :  { %1093 = vmatprep.subr.bf16.mxu0 %v1258_v60 }
 0x11b   :  { %1094 = vmatpush3.bf16.msra.mxu0 %v1259_v61 }
 0x11c   :  { %1095 = vmatprep.subr.bf16.mxu0 %v1260_v62 }
 0x11f   :  { %1096 = vmatpush3.bf16.msra.mxu0 %v1261_v63 }
 0x120   :  { %1097 = vmatprep.subr.bf16.mxu0 %v1262_v0 }
 0x123   :  { %1098 = vmatpush3.bf16.msra.mxu0 %v1264_v3 }
 0x1b9   :  { %v169_v9 = vpop.f32.mrb[4].mxu0 }
 0x1ba   :  { %v1126_v13 = vpop.f32.mrb[5].mxu0 }
 0x1bb   :  { %v172_v18 = vpop.f32.mrb[6].mxu0 }
 0x1bc   :  { %v176_v30 = vpack.c.bf16 %v172_v18, %v169_v9  ;;  %v1127_v31 = vpop.f32.mrb[7].mxu0  ;;  %v1272_v18 = vld [vmem:[%s1715_s10 + $0x80] sm:$0xff]  }
 0x1bd   :  { %v1276_v31 = vld [vmem:[%s1715_s10 + $0xa0] sm:$0xff]  }
 0x1be   :  { %1129 = vmatpush3.bf16.msra.mxu1 %v176_v30  ;;  %v1275_v30 = vld [vmem:[%s1715_s10 + $0x98] sm:$0xff]  }
 0x1bf   :  { %1150 = vmatprep.subr.bf16.mxu1 %v1312_v1 }
 0x1c1   :  { %1131 = vmatmul.mubr.msk.bf16.vlgmr.msra.gmra.mrb[0].mxu1 %vm131_vm4, %v191_v15  ;;  %v1277_v15 = vld [vmem:[%s1715_s10 + $0xa8] sm:$0xff]  }
 0x1c2   :  { %1158 = vmatprep.mubr.msk.bf16.mxu1 %vm1313_vm0, %v1312_v1 }
 0x1c9   :  { %v1144_v16 = vpop.f32.mrb[8].mxu0 }
 0x1ca   :  { %v415_v17 = vpop.f32.mrb[9].mxu0 }
 0x1cb   :  { %v1145_v32 = vpop.f32.mrb[10].mxu0 }
 0x1cc   :  { %v456_v33 = vpack.c.bf16 %v1145_v32, %v1144_v16  ;;  %v418_v34 = vpop.f32.mrb[11].mxu0  ;;  %v1278_v16 = vld [vmem:[%s1715_s10 + $0xb0] sm:$0xff]  }
 0x1cd   :  { %v455_v36 = vpack.c.bf16 %v418_v34, %v415_v17  ;;  %v1279_v17 = vld [vmem:[%s1715_s10 + $0xb8] sm:$0xff]  }
 0x1cf   :  { %1151 = vmatpush3.bf16.msra.mxu1 %v455_v36 }
 0x1d0   :  { %1152 = vmatprep.subr.bf16.mxu1 %v1312_v1 }
 0x1d1   :  { %v1148_v37 = vpop.f32.mrb[12].mxu0 }
 0x1d2   :  { %v431_v38 = vpop.f32.mrb[13].mxu0 }
 0x1d3   :  { %v1149_v39 = vpop.f32.mrb[14].mxu0  ;;  %1153 = vmatpush3.bf16.msra.mxu1 %v456_v33 }
 0x1d4   :  { %v458_v40 = vpack.c.bf16 %v1149_v39, %v1148_v37  ;;  %v434_v41 = vpop.f32.mrb[15].mxu0  ;;  %1154 = vmatprep.subr.bf16.mxu1 %v1312_v1 }
 0x1d5   :  { %v457_v42 = vpack.c.bf16 %v434_v41, %v431_v38  ;;  %v1015_v38 = vld [vmem:[%s1714_s9] ss:$0 sm:$0xff] }
 0x1d7   :  { %1155 = vmatpush3.bf16.msra.mxu1 %v457_v42 }
 0x1d8   :  { %1156 = vmatprep.subr.bf16.mxu1 %v1312_v1 }
 0x1d9   :  { %v540_v43 = vpop.f32.mrb[16].mxu0 }
 0x1da   :  { %v546_v44 = vmax.f32 %v540_v43, 1.0  ;;  %v1172_v45 = vpop.f32.mrb[17].mxu0 }
 0x1db   :  { %1157 = vmatpush3.bf16.msra.mxu1 %v458_v40  ;;  %v543_v46 = vpop.f32.mrb[18].mxu0 }
 0x1dc   :  { %1280 = vrcp.f32 %v546_v44  ;;  %v1173_v47 = vpop.f32.mrb[19].mxu0  ;;  %1174 = vmatprep.subr.bf16.mxu1 %v1312_v1  ;;  %v1024_v46 = vld [vmem:[%s1716_s11] ss:$0 sm:$0xff]  ;;  %s1315_s11 = smov [#allocation2]  }
 0x1de   :  { %1159 = vmatmul.mubr.msk.bf16.vlgmr.msra.gmra.mrb[4].mxu1 %vm368_vm5, %v454_v11 }
 0x1df   :  { %1190 = vmatprep.mubr.msk.bf16.mxu1 %vm1313_vm0, %v1312_v1  ;;  %1175 = vmatpush3.bf16.msra.mxu1 %v1263_v2 }
 0x1e0   :  { %1176 = vmatprep.subr.bf16.mxu1 %v1312_v1 }
 0x1e3   :  { %1177 = vmatpush3.bf16.msra.mxu1 %v1265_v4 }
 0x1e4   :  { %1178 = vmatprep.subr.bf16.mxu1 %v1312_v1 }
 0x1e6   :  { %v1281_v48 = vpop.eup %1280 }
 0x1e7   :  { %550 = vperm.xlu0 %1218, %v1281_v48   ;;  %1179 = vmatpush3.bf16.msra.mxu1 %v1266_v5 }
 0x1e8   :  { %1180 = vmatprep.subr.bf16.mxu1 %v1312_v1 }
 0x1eb   :  { %962 = vperm.xlu0 %1218, %v960_v49   ;;  %1181 = vmatpush3.bf16.msra.mxu1 %v1267_v8 }
 0x1ec   :  { %1182 = vmatprep.subr.bf16.mxu1 %v1312_v1 }
 0x1ef   :  { %1183 = vmatpush3.bf16.msra.mxu1 %v1268_v12 }
 0x1f0   :  { %1184 = vmatprep.subr.bf16.mxu1 %v1312_v1 }
 0x1f3   :  { %1185 = vmatpush3.bf16.msra.mxu1 %v1269_v14 }
 0x1f4   :  { %1186 = vmatprep.subr.bf16.mxu1 %v1312_v1 }
 0x1f7   :  { %1187 = vmatpush3.bf16.msra.mxu1 %v1270_v20 }
 0x1f8   :  { %1188 = vmatprep.subr.bf16.mxu1 %v1312_v1 }
 0x1fb   :  { %1189 = vmatpush3.bf16.msra.mxu1 %v1271_v22 }
 0x1fc   :  { %1194 = vmatprep.subr.bf16.mxu1 %v1312_v1 }
 0x266   :  { %v551_v29 = vpop.permute.xlu0 %550 }
 0x26a   :  { %v963_v47 = vpop.permute.xlu0 %962 }
 0x294   :  { %v229_v23 = vpop.f32.mrb[0].mxu1 }
 0x295   :  { %v1132_v24 = vpop.f32.mrb[1].mxu1  ;;  %v667_v28 = vpack.c.bf16 %v229_v23, %v229_v23 }
 0x296   :  { %v232_v25 = vpop.f32.mrb[2].mxu1 }
 0x297   :  { %v668_v26 = vpack.c.bf16 %v232_v25, %v232_v25  ;;  %v1133_v27 = vpop.f32.mrb[3].mxu1 }
 0x299   :  { %901 = vmatprep.mubr.bf16.mxu0 %v668_v26 }
 0x29a   :  { %902 = vmatmul.mubr.bf16.vlgmr.msra.gmra.mrb[20].mxu0 %v667_v28 }
 0x2b1   :  { %v496_v10 = vpop.f32.mrb[4].mxu1 }
 0x2b2   :  { %v553_v11 = vmul.f32 %v551_v29, %v496_v10  ;;  %v1160_v6 = vpop.f32.mrb[5].mxu1 }
 0x2b3   :  { %v499_v7 = vpop.f32.mrb[6].mxu1 }
 0x2b4   :  { %v554_v9 = vpack.c.bf16 %v553_v11, %v553_v11  ;;  %v1161_v13 = vpop.f32.mrb[7].mxu1 }
 0x2b6   :  { %1191 = vmatmul.mubr.bf16.vlgmr.msra.gmra.mrb[8].mxu1 %v554_v9 }
 0x2b7   :  { %1210 = vmatprep.mubr.msk.bf16.mxu1 %vm1313_vm0, %v1312_v1  ;;  %1195 = vmatpush3.bf16.msra.mxu1 %v1272_v18  ;;  %vm964_vm0 = vcmp.eq.s32.totalorder %v1496_v35, %v963_v47 }
 0x2b8   :  { %1196 = vmatprep.subr.bf16.mxu1 %v1312_v1  ;;  %v965_v54 = vsel %vm964_vm0, 1.0, %v1312_v1 }
 0x2bb   :  { %1197 = vmatpush3.bf16.msra.mxu1 %v1273_v19 }
 0x2bc   :  { %1198 = vmatprep.subr.bf16.mxu1 %v1312_v1 }
 0x2bf   :  { %1199 = vmatpush3.bf16.msra.mxu1 %v1274_v21 }
 0x2c0   :  { %1200 = vmatprep.subr.bf16.mxu1 %v1312_v1 }
 0x2c3   :  { %1201 = vmatpush3.bf16.msra.mxu1 %v1275_v30 }
 0x2c4   :  { %1202 = vmatprep.subr.bf16.mxu1 %v1312_v1 }
 0x2c7   :  { %1203 = vmatpush3.bf16.msra.mxu1 %v1276_v31 }
 0x2c8   :  { %1204 = vmatprep.subr.bf16.mxu1 %v1312_v1 }
 0x2cb   :  { %1205 = vmatpush3.bf16.msra.mxu1 %v1277_v15 }
 0x2cc   :  { %1206 = vmatprep.subr.bf16.mxu1 %v1312_v1 }
 0x2cf   :  { %1207 = vmatpush3.bf16.msra.mxu1 %v1278_v16 }
 0x2d0   :  { %1208 = vmatprep.subr.bf16.mxu1 %v1312_v1 }
 0x2d3   :  { %1209 = vmatpush3.bf16.msra.mxu1 %v1279_v17 }
 0x36d   :  { %v1099_v32 = vpop.f32.mrb[20].mxu0 }
 0x36e   :  { %v1100_v33 = vpop.f32.mrb[21].mxu0 }
 0x36f   :  { %v1101_v34 = vadd.f32 %v1100_v33, %v1099_v32  ;;  %v1102_v36 = vpop.f32.mrb[22].mxu0 }
 0x370   :  { %v1103_v37 = vpop.f32.mrb[23].mxu0 }
 0x371   :  { %v904_v48 = vadd.f32 %v1101_v34, %v1024_v46 }
 0x389   :  { %v660_v39 = vpop.f32.mrb[8].mxu1 }
 0x38a   :  { %v661_v40 = vadd.f32 %v1015_v38, %v660_v39  ;;  %v1192_v41 = vpop.f32.mrb[9].mxu1 }
 0x38b   :  { %v663_v42 = vpop.f32.mrb[10].mxu1 }
 0x38c   :  { %1282 = vtanh.f32 %v661_v40  ;;  %v1193_v43 = vpop.f32.mrb[11].mxu1 }
 0x396   :  { %v1283_v44 = vpop.eup %1282 }
 0x397   :  { %v669_v45 = vpack.c.bf16 %v1283_v44, %v1283_v44 }
 0x399   :  { %1211 = vmatmul.mubr.bf16.vlgmr.msra.gmra.mrb[12].mxu1 %v669_v45 }
 0x46c   :  { %v943_v49 = vpop.f32.mrb[12].mxu1 }
 0x46d   :  { %v944_v50 = vadd.f32 %v943_v49, %v904_v48  ;;  %v1212_v51 = vpop.f32.mrb[13].mxu1 }
 0x46e   :  { %v946_v52 = vpop.f32.mrb[14].mxu1 }
 0x46f   :  { %949 = vst [vmem:[%s1718_s13] sm:$0xff] %v944_v50  ;;  %950 = vmax.xlane.f32.xlu1 %v944_v50  ;;  %v1213_v53 = vpop.f32.mrb[15].mxu1  ;;  %v966_v55 = vmul.f32 %v965_v54, %v944_v50  ;;  %s987_s13 = sshll.u32 %s1315_s11, 4  ;;  %s988_s13 = int_to_ptr.vmem [resolvable:$true] %s987_s13 }
 0x470   :  { %s1288_s2 = scalar_lea.vmem %s988_s13, 16  ;;  %s1292_s21 = scalar_lea.vmem %s988_s13, 32 }
 0x471   :  { %p1289_p0 = scmp.ne.s32.totalorder %s988_s13, %s1288_s2  ;;  %p1293_p1 = scmp.lt.s32.totalorder %s988_s13, %s988_s13 }
 0x472   :  { %p1294_p2 = scmp.lt.s32.totalorder %s1292_s21, %s1288_s2 }
 0x473   :  { %967 = vadd.xlane.f32.xlu1 %v966_v55 }
 0x474   :  { %p1295_p3 = por %p1294_p2, %p1293_p1 }
 0x476   :  { %p1296_p4 = pnand %p1295_p3, %p1289_p0 }
 0x4fc   :  { %v951_v56 = vpop.xlane.xlu1 %950 }
 0x4fd   :  { %v952_v57 = vsub.f32 %v944_v50, %v951_v56 }
 0x4ff   :  { %v953_v58 = vmul.f32 1.442695, %v952_v57 }
 0x500   :  { %v968_v63 = vpop.xlane.xlu1 %967 }
 0x501   :  { %1284 = vpow2.f32 %v953_v58 }
 0x50b   :  { %v1285_v59 = vpop.eup %1284 }
 0x50c   :  { %955 = vadd.xlane.f32.xlu0 %v1285_v59 }
 0x599   :  { %v956_v35 = vpop.xlane.xlu0 %955 }
 0x59a   :  { %1286 = vlog2.f32 %v956_v35 }
 0x5a4   :  { %v1287_v60 = vpop.eup %1286 }
 0x5a5   :  { %v958_v61 = vmul.f32 0.6931472, %v1287_v60 }
 0x5a7   :  { %v959_v62 = vadd.f32 %v958_v61, %v951_v56 }
 0x5a9   :  { %v969_v0 = vsub.f32 %v959_v62, %v968_v63 }
 0x5ab   :  { %v970_v2 = vrot.slane %v969_v0, 4 }
 0x5ad   :  { %v971_v3 = vadd.f32 %v970_v2, %v969_v0 }
 0x5af   :  { %v972_v4 = vrot.slane %v971_v3, 2 }
 0x5b1   :  { %v973_v5 = vadd.f32 %v972_v4, %v971_v3 }
 0x5b3   :  { %v974_v1 = vrot.slane %v973_v5, 1 }
 0x5b5   :  { %v975_v8 = vadd.f32 %v974_v1, %v973_v5 }
 0x5b7   :  { %v976_v12 = vmul.f32 0.125, %v975_v8 }
 0x5b9   :  { %978 = vst.msk [vmem:[#allocation2] sm:$0x1] %vm977_vm2, %v976_v12 }
 0x5ba   :  { %1299 = shalt.err (!%p1296_p4)
}
 0x5bb   :  { %s1300_s0 = scalar_lea.hbm %s1719_s14, 16 }
 0x5bc   :  { %p1301_p5 = scmp.ne.s32.totalorder %s1719_s14, %s1300_s0  ;;  %p1304_p6 = scmp.lt.u32.totalorder %s1300_s0, %s1719_s14 }
 0x5be   :  { %p1306_p7 = pnand %p1304_p6, %p1301_p5 }
 0x5c0   :  { %1309 = shalt.err (!%p1306_p7)
}
 0x5c1   :  { %990 = dma.vmem_to_hbm [thread:$0]  %s988_s13, 16, %s1719_s14, [#allocation3]  }
 0x5c2   :  { %1310 = dma.done.wait [#allocation3], 16  }
 0x5c3   :  { %1311 = vsyncadd [#allocation3], 4294967280 }
 0x5c4   :  { %996 = vsyncpa [#allocation3], 1 }

</bundles_post_ra>
